<compile_context>
chip_gen: v7x
topology: tpu7x:2x2x1
jax: 0.10.0
libtpu: 0.0.40
codegen_flags: <defaults>
</compile_context>

<pallas_src>
import math

import jax
import jax.numpy as jnp
from jax.experimental import pallas as pl
from jax.experimental.pallas import tpu as pltpu

IN_DIM = 38
HID_DIM = 30
OUT_DIM = 4


def driver_mlp_kernel(x_ref, w1_ref, b1_ref, w2_ref, b2_ref, o_ref):
    # x_ref:  (IN_DIM, TB) bf16/f32 -- batch on lanes (lane-dense stream)
    # w1_ref: (HID_DIM, IN_DIM) same dtype as x (resident)
    # b1_ref: (HID_DIM, 1) f32, w2_ref: (OUT_DIM, HID_DIM) f32, b2_ref: (OUT_DIM, 1) f32
    h = jnp.dot(w1_ref[...], x_ref[...], preferred_element_type=jnp.float32)
    h = jnp.maximum(h + b1_ref[...], 0.0)
    z = jnp.dot(w2_ref[...], h, preferred_element_type=jnp.float32) + b2_ref[...]
    # sigmoid = 1 / (1 + exp(-z)): exp on the EUP, approx reciprocal on the EUP.
    o_ref[...] = pl.reciprocal(1.0 + jnp.exp(-z), approx=True)


def _round_up(v, m):
    return ((v + m - 1) // m) * m


def driver_forward(x_t, w1, b1, w2, b2, *, block_b=16384, min_pallas_batch=512):
    """MLP head.

    x_t: (38, B) features, batch on lanes (bf16 recommended, f32 accepted).
    w1: (30, 38) f32; b1: (30,) f32; w2: (4, 30) f32; b2: (4,) f32.
    Returns (4, B) f32 action probabilities (batch on lanes; no transpose).
    """
    assert x_t.shape[0] == IN_DIM
    B = x_t.shape[1]

    # Tiny batches: kernel launch + step overhead dwarfs the work.
    if B < min_pallas_batch:
        return _reference(x_t, w1, b1, w2, b2)

    # Batch tile on the lane axis: multiple of 128; keep >= 2 grid steps for
    # mid/large batches so v7x's two TensorCores both get work.
    if B <= 128:
        tb = B
    else:
        half_tiles = pl.cdiv(B, 2 * 128)
        tb = max(128, min(block_b, half_tiles * 128))
    grid = (pl.cdiv(B, tb),)

    x_itemsize = jnp.dtype(x_t.dtype).itemsize
    w1c = w1.astype(x_t.dtype)          # tiny resident weight, match stream dtype
    b1_2d = b1.reshape(HID_DIM, 1).astype(jnp.float32)
    b2_2d = b2.reshape(OUT_DIM, 1).astype(jnp.float32)
    w2f = w2.astype(jnp.float32)

    # Double-buffered streaming VMEM footprint (sublane-padded).
    stream_bytes = 2 * (
        _round_up(IN_DIM, 8) * tb * x_itemsize + _round_up(OUT_DIM, 8) * tb * 4
    )
    cparams = {"dimension_semantics": ("parallel",)}
    if stream_bytes > 12 * 1024 * 1024:
        cparams["vmem_limit_bytes"] = int(min(2 * stream_bytes, 64 * 1024 * 1024))

    cost = pl.CostEstimate(
        flops=2 * B * (IN_DIM * HID_DIM + HID_DIM * OUT_DIM),
        transcendentals=2 * B * OUT_DIM,  # exp + reciprocal per output element
        bytes_accessed=(
            B * IN_DIM * x_itemsize            # x stream (dominant)
            + B * OUT_DIM * 4                  # output stream
            + HID_DIM * IN_DIM * x_itemsize + HID_DIM * 4
            + OUT_DIM * HID_DIM * 4 + OUT_DIM * 4
        ),
    )

    return pl.pallas_call(
        driver_mlp_kernel,
        out_shape=jax.ShapeDtypeStruct((OUT_DIM, B), jnp.float32),
        grid_spec=pl.GridSpec(
            grid=grid,
            in_specs=[
                pl.BlockSpec((IN_DIM, tb), lambda i: (0, i)),        # x stream
                pl.BlockSpec((HID_DIM, IN_DIM), lambda i: (0, 0)),   # W1 resident
                pl.BlockSpec((HID_DIM, 1), lambda i: (0, 0)),        # b1 resident
                pl.BlockSpec((OUT_DIM, HID_DIM), lambda i: (0, 0)),  # W2 resident
                pl.BlockSpec((OUT_DIM, 1), lambda i: (0, 0)),        # b2 resident
            ],
            out_specs=pl.BlockSpec((OUT_DIM, tb), lambda i: (0, i)),
        ),
        compiler_params=pltpu.CompilerParams(**cparams),
        cost_estimate=cost,
    )(x_t, w1c, b1_2d, w2f, b2_2d)


def init_params(key):
    """Deterministic init mimicking torch.nn.Linear (U[-1/sqrt(fan_in), +])."""
    k1, k2, k3, k4 = jax.random.split(key, 4)
    bound1 = 1.0 / math.sqrt(IN_DIM)
    bound2 = 1.0 / math.sqrt(HID_DIM)
    w1 = jax.random.uniform(k1, (HID_DIM, IN_DIM), jnp.float32, -bound1, bound1)
    b1 = jax.random.uniform(k2, (HID_DIM,), jnp.float32, -bound1, bound1)
    w2 = jax.random.uniform(k3, (OUT_DIM, HID_DIM), jnp.float32, -bound2, bound2)
    b2 = jax.random.uniform(k4, (OUT_DIM,), jnp.float32, -bound2, bound2)
    return w1, b1, w2, b2


def build_input(key, batch, dtype=jnp.bfloat16):
    """Features emitted directly in (38, B) batch-on-lanes layout (no x.T).

    # TODO(synk): rotate()/is_out() track geometry is external game state with
    # no tensor equivalent; sensors are modeled as deterministic {0,1} draws
    # (exact in bf16).
    """
    k_speed, k_heading, k_sensors = jax.random.split(key, 3)
    speed = jax.random.uniform(k_speed, (1, batch), jnp.float32, 0.0, 80.0)
    heading = jax.random.uniform(k_heading, (1, batch), jnp.float32, 0.0, 360.0)
    sensors = jax.random.bernoulli(k_sensors, 0.3, (35, batch)).astype(jnp.float32)
    x_t = jnp.concatenate(
        [speed / 80.0, heading / 360.0, -heading / 360.0, sensors], axis=0
    )
    assert x_t.shape == (IN_DIM, batch)
    return x_t.astype(dtype)


def _reference(x_t, w1, b1, w2, b2):
    """Pure-JAX reference in the same (dim, batch) layout; f32 math on the
    (possibly bf16) inputs to match the kernel's numerics."""
    xf = x_t.astype(jnp.float32)
    w1f = w1.astype(x_t.dtype).astype(jnp.float32)
    h = jnp.maximum(w1f @ xf + b1[:, None], 0.0)
    return jax.nn.sigmoid(w2.astype(jnp.float32) @ h + b2[:, None])


if __name__ == "__main__":
    key = jax.random.PRNGKey(0)
    k_params, k_in1, k_in2 = jax.random.split(key, 3)
    w1, b1, w2, b2 = init_params(k_params)

    # Small batch: single grid step, full-extent lane block (force kernel path).
    batch = 8
    x_t = build_input(k_in1, batch)
    probas = jax.block_until_ready(
        driver_forward(x_t, w1, b1, w2, b2, min_pallas_batch=0)
    )
    ref = _reference(x_t, w1, b1, w2, b2)
    assert probas.shape == (OUT_DIM, batch)
    # Tolerance covers bf16 feature stream + approx reciprocal in the sigmoid.
    assert jnp.allclose(probas, ref, atol=2e-2, rtol=0.0)

    # Batch-tiled path: tb=128 -> grid=(4,), exercises the pipelined stream and
    # >=2 grid steps (v7x megacore sharding).
    batch2 = 512
    x2_t = build_input(k_in2, batch2)
    probas2 = jax.block_until_ready(
        driver_forward(x2_t, w1, b1, w2, b2, block_b=128, min_pallas_batch=0)
    )
    ref2 = _reference(x2_t, w1, b1, w2, b2)
    assert probas2.shape == (OUT_DIM, batch2)
    assert jnp.allclose(probas2, ref2, atol=2e-2, rtol=0.0)

    print("KERNEL_OK")
</pallas_src>

<mosaic_0001>
module attributes {stable_mosaic.version = 11 : i64} {
  func.func @driver_mlp_kernel(%arg0: i32, %arg1: memref<38x8xbf16, #tpu.memory_space<vmem>>, %arg2: memref<30x38xbf16, #tpu.memory_space<vmem>>, %arg3: memref<30x1xf32, #tpu.memory_space<vmem>>, %arg4: memref<4x30xf32, #tpu.memory_space<vmem>>, %arg5: memref<4x1xf32, #tpu.memory_space<vmem>>, %arg6: memref<4x8xf32, #tpu.memory_space<vmem>>) attributes {dimension_semantics = [#tpu.dimension_semantics<parallel>], iteration_bounds = array<i64: 1>, scalar_prefetch = 0 : i64, scratch_operands = 0 : i64, tpu.core_type = #tpu.core_type<tc>, window_params = [{transform_indices = @transform_0, window_bounds = array<i64: 38, 8>}, {pipeline_mode = #tpu.pipeline_mode<synchronous>, transform_indices = @transform_1, window_bounds = array<i64: 30, 38>}, {pipeline_mode = #tpu.pipeline_mode<synchronous>, transform_indices = @transform_2, window_bounds = array<i64: 30, 1>}, {pipeline_mode = #tpu.pipeline_mode<synchronous>, transform_indices = @transform_3, window_bounds = array<i64: 4, 30>}, {pipeline_mode = #tpu.pipeline_mode<synchronous>, transform_indices = @transform_4, window_bounds = array<i64: 4, 1>}, {transform_indices = @transform_5, window_bounds = array<i64: 4, 8>}]} {
    %c0 = arith.constant 0 : index
    %c0_0 = arith.constant 0 : index
    %0 = vector.load %arg2[%c0, %c0_0] : memref<30x38xbf16, #tpu.memory_space<vmem>>, vector<30x38xbf16>
    %c0_1 = arith.constant 0 : index
    %c0_2 = arith.constant 0 : index
    %1 = vector.load %arg1[%c0_1, %c0_2] : memref<38x8xbf16, #tpu.memory_space<vmem>>, vector<38x8xbf16>
    %cst = arith.constant dense<0.000000e+00> : vector<30x8xf32>
    %2 = tpu.matmul %0, %1, %cst {dimension_numbers = #tpu.dot_dimension_numbers<[1], [0], [0], [1], [0, 0, 1, 1], [], []>} : vector<30x38xbf16>, vector<38x8xbf16>, vector<30x8xf32> -> vector<30x8xf32>
    %c0_3 = arith.constant 0 : index
    %c0_4 = arith.constant 0 : index
    %3 = vector.load %arg3[%c0_3, %c0_4] : memref<30x1xf32, #tpu.memory_space<vmem>>, vector<30x1xf32>
    %4 = vector.broadcast %3 : vector<30x1xf32> to vector<30x8xf32>
    %5 = arith.addf %2, %4 : vector<30x8xf32>
    %cst_5 = arith.constant 0.000000e+00 : f32
    %6 = vector.broadcast %cst_5 : f32 to vector<30x8xf32>
    %7 = arith.maximumf %5, %6 : vector<30x8xf32>
    %c0_6 = arith.constant 0 : index
    %c0_7 = arith.constant 0 : index
    %8 = vector.load %arg4[%c0_6, %c0_7] : memref<4x30xf32, #tpu.memory_space<vmem>>, vector<4x30xf32>
    %cst_8 = arith.constant dense<0.000000e+00> : vector<4x8xf32>
    %9 = tpu.matmul %8, %7, %cst_8 {dimension_numbers = #tpu.dot_dimension_numbers<[1], [0], [0], [1], [0, 0, 1, 1], [], []>} : vector<4x30xf32>, vector<30x8xf32>, vector<4x8xf32> -> vector<4x8xf32>
    %c0_9 = arith.constant 0 : index
    %c0_10 = arith.constant 0 : index
    %10 = vector.load %arg5[%c0_9, %c0_10] : memref<4x1xf32, #tpu.memory_space<vmem>>, vector<4x1xf32>
    %11 = vector.broadcast %10 : vector<4x1xf32> to vector<4x8xf32>
    %12 = arith.addf %9, %11 : vector<4x8xf32>
    %cst_11 = arith.constant 0.000000e+00 : f32
    %13 = vector.broadcast %cst_11 : f32 to vector<4x8xf32>
    %14 = arith.subf %13, %12 : vector<4x8xf32>
    %15 = math.exp %14 : vector<4x8xf32>
    %cst_12 = arith.constant 1.000000e+00 : f32
    %16 = vector.broadcast %cst_12 : f32 to vector<4x8xf32>
    %17 = arith.addf %16, %15 : vector<4x8xf32>
    %18 = tpu.reciprocal %17 {approx = true} : vector<4x8xf32> -> vector<4x8xf32>
    %c0_13 = arith.constant 0 : index
    %c0_14 = arith.constant 0 : index
    %19 = vector.load %arg6[%c0_13, %c0_14] : memref<4x8xf32, #tpu.memory_space<vmem>>, vector<4x8xf32>
    tpu.vector_store %arg6[%c0_13, %c0_14], %18 {strides = array<i32>} : memref<4x8xf32, #tpu.memory_space<vmem>>, vector<4x8xf32>,
    return
  }
  func.func @transform_0(%arg0: i32) -> (i32, i32) {
    %c0_i32 = arith.constant 0 : i32
    %c0_i32_0 = arith.constant 0 : i32
    return %c0_i32, %arg0 : i32, i32
  }
  func.func @transform_1(%arg0: i32) -> (i32, i32) {
    %c0_i32 = arith.constant 0 : i32
    %c0_i32_0 = arith.constant 0 : i32
    %c0_i32_1 = arith.constant 0 : i32
    return %c0_i32, %c0_i32_0 : i32, i32
  }
  func.func @transform_2(%arg0: i32) -> (i32, i32) {
    %c0_i32 = arith.constant 0 : i32
    %c0_i32_0 = arith.constant 0 : i32
    %c0_i32_1 = arith.constant 0 : i32
    return %c0_i32, %c0_i32_0 : i32, i32
  }
  func.func @transform_3(%arg0: i32) -> (i32, i32) {
    %c0_i32 = arith.constant 0 : i32
    %c0_i32_0 = arith.constant 0 : i32
    %c0_i32_1 = arith.constant 0 : i32
    return %c0_i32, %c0_i32_0 : i32, i32
  }
  func.func @transform_4(%arg0: i32) -> (i32, i32) {
    %c0_i32 = arith.constant 0 : i32
    %c0_i32_0 = arith.constant 0 : i32
    %c0_i32_1 = arith.constant 0 : i32
    return %c0_i32, %c0_i32_0 : i32, i32
  }
  func.func @transform_5(%arg0: i32) -> (i32, i32) {
    %c0_i32 = arith.constant 0 : i32
    %c0_i32_0 = arith.constant 0 : i32
    return %c0_i32, %arg0 : i32, i32
  }
}

</mosaic_0001>

<bundles_post_ra>
// kernel: tpu_custom_call.1
= control target key start
LH: loop header
LB: loop body
LE: loop exit
PB: predicated region body
PF: predicated region fallthrough
CT: control target
= control target key end

     0   :  { %vm80_vm0 = vcmask 310272   ;;  %vm87_vm1 = vcmask 1042432   ;;  %v339_v4 = vmov 0   ;;  %s422_s0 = inlined_call_operand.vmem [shape: bf16[38,8], index: 0, kind: input, shape index: {}]   ;;  %s423_s1 = inlined_call_operand.vmem [shape: bf16[30,38], index: 1, kind: input, shape index: {}]   ;;  %s424_s2 = inlined_call_operand.vmem [shape: f32[30,1], index: 2, kind: input, shape index: {}]   ;;  %s425_s3 = inlined_call_operand.vmem [shape: f32[4,30], index: 3, kind: input, shape index: {}]   ;;  %s426_s4 = inlined_call_operand.vmem [shape: f32[4,1], index: 4, kind: input, shape index: {}]   ;;  %s427_s5 = inlined_call_operand.hbm [shape: f32[4,8], index: 5, kind: output, shape index: {}]  }
   0x1   :  { %v306_v0 = vld [vmem:[%s422_s0] sm:$0xff]   ;;  %v307_v1 = vld [vmem:[%s422_s0 + $0x8] sm:$0xff]   ;;  %v308_v3 = vld [vmem:[%s422_s0 + $0x10] ss:$0 sps:$4 sm:$0x77]   ;;  %304 = vset.pattern.permute.xlu0 %v339_v4  ;;  %305 = vset.pattern.permute.xlu1 %v339_v4 }
   0x2   :  { %269 = vmatprep.subr.bf16.mxu0 %v306_v0  ;;  %v309_v2 = vld [vmem:[%s423_s1] sm:$0xff]   ;;  %v33_v6 = vld [vmem:[%s424_s2 + $0x10] sm:$0xff] }
   0x3   :  { %270 = vmatpush3.bf16.msra.mxu0 %v306_v0  ;;  %275 = vmatprep.mubr.msk.bf16.mxu0 %vm80_vm0, %v309_v2  ;;  %v31_v5 = vld [vmem:[%s424_s2] sm:$0xff] }
   0x4   :  { %271 = vmatprep.subr.bf16.mxu0 %v307_v1  ;;  %37 = vperm.xlu0 %304, %v31_v5  }
   0x5   :  { %47 = vperm.xlu1 %305, %v33_v6  }
   0x6   :  { %10 = vsyncpa [#allocation3], 0  ;;  %v32_v7 = vld [vmem:[%s424_s2 + $0x8] sm:$0xff]  ;;  %v34_v8 = vld [vmem:[%s424_s2 + $0x18] sm:$0x3f]  ;;  %v89_v9 = vsel %vm87_vm1, %v308_v3, 0 }
   0x7   :  { %272 = vmatpush3.bf16.msra.mxu0 %v307_v1  ;;  %v310_v10 = vld [vmem:[%s423_s1 + $0x8] sm:$0x7f]   ;;  %v145_v11 = vld [vmem:[%s426_s4] sm:$0xf]  ;;  %v340_v12 = vmov 0.0|0.0   ;;  %vm341_vm2 = vmmov 0  }
   0x8   :  { %297 = vmatprep.subr.msk.bf16.mxu0 %vm87_vm1, %v308_v3  ;;  %42 = vperm.xlu0 %304, %v32_v7   ;;  %v342_v13 = vmov 0.0   ;;  %vm155_vm3 = vcmask 1045504   ;;  %vm343_vm4 = vmmov 1   ;;  %v144_v32 = vld [vmem:[%s425_s3] sm:$0xf]  ;;  %vm151_vm6 = vcmask 244736  }
   0x9   :  { %52 = vperm.xlu1 %305, %v34_v8   ;;  %290 = vmatprep.subr.bf16.mxu1 %v340_v12  ;;  %vm295_vm5 = vmpackc.low %vm155_vm3, %vm343_vm4  ;;  %s344_s4 = smov [#allocation2]   ;;  %vm234_vm7 = vcmask 60416  }
   0xa   :  { %287 = vmatprep.mubr.msk.f32.mxu1 %vm341_vm2, %v342_v13  ;;  %s242_s12 = sshll.u32 %s344_s4, 4  ;;  %s243_s12 = int_to_ptr.vmem [resolvable:$true] %s242_s12 }
   0xb   :  { %274 = vmatpush3.bf16.msra.mxu0 %v89_v9  ;;  %s315_s13 = scalar_lea.vmem %s243_s12, 64  ;;  %p320_p1 = scmp.lt.s32.totalorder %s243_s12, %s243_s12 }
   0xc   :  { %148 = vperm.xlu0 %304, %v145_v11   ;;  %p316_p0 = scmp.ne.s32.totalorder %s243_s12, %s315_s13  ;;  %p321_p2 = scmp.lt.s32.totalorder %s315_s13, %s315_s13 }
   0xe   :  { %276 = vmatmul.mubr.msk.bf16.vlgmr.msra.gmra.mrb[0].mxu0 %vm80_vm0, %v310_v10  ;;  %p322_p3 = por %p321_p2, %p320_p1 }
  0x10   :  { %p323_p4 = pnand %p322_p3, %p316_p0 }
  0x83   :  { %v38_v15 = vpop.permute.xlu0 %37 }
  0x84   :  { %v48_v14 = vpop.permute.xlu1 %47 }
  0x87   :  { %v43_v22 = vpop.permute.xlu0 %42 }
  0x88   :  { %v53_v17 = vpop.permute.xlu1 %52 }
  0x8b   :  { %v149_v33 = vpop.permute.xlu0 %148 }
  0xe1   :  { %v277_v16 = vpop.f32.mrb[0].mxu0 }
  0xe2   :  { %v134_v18 = vadd.f32 %v277_v16, %v48_v14  ;;  %v125_v19 = vpop.f32.mrb[1].mxu0 }
  0xe3   :  { %v126_v20 = vadd.f32 %v125_v19, %v38_v15  ;;  %v278_v21 = vpop.f32.mrb[2].mxu0 }
  0xe4   :  { %v137_v23 = vadd.f32 %v278_v21, %v53_v17  ;;  %v128_v24 = vpop.f32.mrb[3].mxu0  ;;  %v142_v26 = vmax.f32 %v134_v18, 0.0 }
  0xe5   :  { %v129_v25 = vadd.f32 %v128_v24, %v43_v22  ;;  %v140_v28 = vmax.f32 %v126_v20, 0.0 }
  0xe6   :  { %v143_v27 = vmax.f32 %v137_v23, 0.0 }
  0xe7   :  { %v141_v29 = vmax.f32 %v129_v25, 0.0 }
  0xe8   :  { %v294_v30 = vpack.c.bf16 %v143_v27, %v142_v26 }
  0xe9   :  { %v291_v31 = vpack.c.bf16 %v141_v29, %v140_v28 }
  0xeb   :  { %292 = vmatpush3.bf16.msra.mxu1 %v291_v31 }
  0xec   :  { %293 = vmatprep.subr.bf16.mxu1 %v340_v12 }
  0xef   :  { %296 = vmatpush3.bf16.msk.msra.mxu1 %vm295_vm5, %v294_v30 }
  0xf2   :  { %288 = vmatmul.mubr.msk.f32.vlgmr.msra.gmra.mrb[0].mxu1 %vm151_vm6, %v144_v32 }
 0x1c5   :  { %v225_v34 = vpop.f32.mrb[0].mxu1 }
 0x1c6   :  { %v226_v35 = vadd.f32 %v225_v34, %v149_v33  ;;  %v289_v36 = vpop.f32.mrb[1].mxu1 }
 0x1c8   :  { %v229_v37 = vsub.f32 0.0, %v226_v35 }
 0x1ca   :  { %v230_v38 = vmul.f32 1.442695, %v229_v37 }
 0x1cc   :  { %311 = vpow2.f32 %v230_v38 }
 0x1d6   :  { %v312_v39 = vpop.eup %311 }
 0x1d7   :  { %v232_v40 = vadd.f32 1.0, %v312_v39 }
 0x1d9   :  { %313 = vrcp.f32 %v232_v40 }
 0x1e3   :  { %v314_v41 = vpop.eup %313 }
 0x1e4   :  { %235 = vst.msk [vmem:[#allocation2] sm:$0xf] %vm234_vm7, %v314_v41 }
 0x1e5   :  { %326 = shalt.err (!%p323_p4)
}
 0x1e6   :  { %s327_s15 = scalar_lea.hbm %s427_s5, 64 }
 0x1e7   :  { %p328_p5 = scmp.ne.s32.totalorder %s427_s5, %s327_s15  ;;  %p331_p6 = scmp.lt.u32.totalorder %s327_s15, %s427_s5 }
 0x1e9   :  { %p333_p7 = pnand %p331_p6, %p328_p5 }
 0x1eb   :  { %336 = shalt.err (!%p333_p7)
}
 0x1ec   :  { %245 = dma.vmem_to_hbm [thread:$0]  %s243_s12, 64, %s427_s5, [#allocation3]  }
 0x1ed   :  { %337 = dma.done.wait [#allocation3], 64  }
 0x1ee   :  { %338 = vsyncadd [#allocation3], 4294967232 }
 0x1ef   :  { %249 = vsyncpa [#allocation3], 1 }

</bundles_post_ra>
